<compile_context>
chip_gen: v6e
topology: v6e:2x2x1
jax: 0.10.0
libtpu: 0.0.40
codegen_flags: <defaults>
</compile_context>

<pallas_src>
import functools

import jax
import jax.numpy as jnp
from jax.experimental import pallas as pl
from jax.experimental.pallas import tpu as pltpu

EPS = 1e-12  # F.normalize default eps


def _round_up(n, m):
    return ((n + m - 1) // m) * m


def _largest_tile(n, cap, unit):
    """Largest t with t | n, t % unit == 0 and t <= cap; else n (full dim is always legal)."""
    if n <= cap:
        return n
    t = (cap // unit) * unit
    while t >= unit:
        if n % t == 0:
            return t
        t -= unit
    return n


# --------------- fused kernel: per-pixel normalize + 1x1 conv + P-group max ---------------
def _ecc_fused_kernel(x_ref, p_ref, o_ref, *, num_protos, kp_valid):
    x = x_ref[0]                                                   # (C, t_hw), lanes = HW
    sumsq = jnp.sum(x * x, axis=0, keepdims=True)                  # (1, t_hw) sublane reduce
    inv = jax.lax.rsqrt(jnp.maximum(sumsq, EPS * EPS))             # 1/max(||x||, eps) (EUP)
    d = jnp.dot(p_ref[...], x, preferred_element_type=jnp.float32)  # (KPp, t_hw) on MXU
    d = d * inv                                                    # per-pixel column scale
    kpp, t_hw = d.shape
    g = t_hw // num_protos
    # torch's flat .view groups P consecutive HW lanes of one (b, kp) row; put those P
    # lanes on the 8 sublanes of one native tile and reduce there, then restore a
    # lane-dense (KPp, g) layout for the store.
    d_t = jnp.transpose(d)                                         # (t_hw, KPp)
    m_t = jnp.max(d_t.reshape(g, num_protos, kpp), axis=1)         # (g, KPp) sublane-group max
    m = jnp.transpose(m_t)                                         # (KPp, g) groups on lanes
    o_ref[0] = m[:kp_valid, :]                                     # drop padded prototype rows


# --------------- fallback kernels (only used when HW % P != 0) ---------------
def _norm_matmul_kernel(x_ref, p_ref, o_ref):
    x = x_ref[0]                                                   # (C, t_hw)
    sumsq = jnp.sum(x * x, axis=0, keepdims=True)
    inv = jax.lax.rsqrt(jnp.maximum(sumsq, EPS * EPS))
    d = jnp.dot(p_ref[...], x, preferred_element_type=jnp.float32)
    o_ref[0] = d * inv


def _segmax_kernel(d_ref, o_ref, *, num_classes, protos_per_class, scale):
    d = d_ref[0]                                                   # (t_r, K*P) scrambled rows
    parts = []
    for k in range(num_classes):                                   # static tiny loop (K classes)
        sl = d[:, k * protos_per_class:(k + 1) * protos_per_class]
        parts.append(jnp.max(sl, axis=-1, keepdims=True))
    o_ref[0] = jnp.concatenate(parts, axis=-1) * scale             # (t_r, K)


# -------------------------------- wrappers --------------------------------
def _ecc_fused(x_r, proto_n, B, C, H, W, K, P, scale, hw_tile):
    KP, HW = K * P, H * W
    KPp = _round_up(KP, 128)  # pad rows so in-kernel relayouts are (8,128)-aligned

    # out_scale commutes with max only when non-negative; otherwise apply after.
    post = 1.0
    if scale >= 0.0:
        proto_k = proto_n * scale
    else:
        proto_k, post = proto_n, scale
    proto_pad = jnp.zeros((KPp, C), jnp.float32).at[:KP, :].set(proto_k)

    # tile: t_hw | HW, multiple of 128*P (output blocks stay lane-dense) or full HW;
    # bounded by a value-footprint budget so v5e's 16 MiB scoped VMEM is never exceeded.
    unit = 128 * P
    per_lane_bytes = 4 * (3 * C + 3 * KPp)
    budget_lanes = max(unit, (10 << 20) // per_lane_bytes)
    cap = max(unit, min(hw_tile, budget_lanes))
    t_hw = _largest_tile(HW, cap, unit)
    if B * (HW // t_hw) < 2:
        # keep both v7x TensorCores fed when the grid would collapse to a single step
        t2 = _largest_tile(HW, max(unit, HW // 2), unit)
        if t2 < HW:
            t_hw = t2
    g_t = t_hw // P

    m = pl.pallas_call(
        functools.partial(_ecc_fused_kernel, num_protos=P, kp_valid=KP),
        out_shape=jax.ShapeDtypeStruct((B, KP, HW // P), jnp.float32),
        grid=(B, HW // t_hw),
        in_specs=[
            pl.BlockSpec((1, C, t_hw), lambda b, j: (b, 0, j)),
            pl.BlockSpec((KPp, C), lambda b, j: (0, 0)),
        ],
        out_specs=pl.BlockSpec((1, KP, g_t), lambda b, j: (b, 0, j)),
        compiler_params=pltpu.CompilerParams(
            dimension_semantics=("parallel", "parallel")),
    )(x_r, proto_pad)

    # torch's  d.view(B*H*W, K, P).max(-1)  on NCHW data == flat reinterpretation of m
    out = jnp.transpose(m.reshape(B, HW, K), (0, 2, 1)).reshape(B, K, H, W)
    return out if post == 1.0 else out * post


def _ecc_two_kernel(x_r, proto_n, B, C, H, W, K, P, scale, hw_tile, row_tile):
    """Fallback (HW % P != 0): normalize+matmul kernel, then segmented max on the scramble."""
    KP, HW = K * P, H * W
    t_hw = _largest_tile(HW, hw_tile, 128)
    d = pl.pallas_call(
        _norm_matmul_kernel,
        out_shape=jax.ShapeDtypeStruct((B, KP, HW), jnp.float32),
        grid=(B, HW // t_hw),
        in_specs=[
            pl.BlockSpec((1, C, t_hw), lambda b, j: (b, 0, j)),
            pl.BlockSpec((KP, C), lambda b, j: (0, 0)),
        ],
        out_specs=pl.BlockSpec((1, KP, t_hw), lambda b, j: (b, 0, j)),
        compiler_params=pltpu.CompilerParams(
            dimension_semantics=("parallel", "parallel")),
    )(x_r, proto_n)

    d_scr = d.reshape(B, HW, KP)  # free reinterpretation == torch's flat .view scramble
    t_r = _largest_tile(HW, row_tile, 8)
    m = pl.pallas_call(
        functools.partial(_segmax_kernel, num_classes=K, protos_per_class=P, scale=scale),
        out_shape=jax.ShapeDtypeStruct((B, HW, K), jnp.float32),
        grid=(B, HW // t_r),
        in_specs=[pl.BlockSpec((1, t_r, KP), lambda b, j: (b, j, 0))],
        out_specs=pl.BlockSpec((1, t_r, K), lambda b, j: (b, j, 0)),
        compiler_params=pltpu.CompilerParams(
            dimension_semantics=("parallel", "parallel")),
    )(d_scr)
    return jnp.transpose(m, (0, 2, 1)).reshape(B, K, H, W)


def ecc_forward(x, prototype, out_scale=10.0, *, hw_tile=8192, row_tile=2048):
    """x: (B, C, H, W) float32 NCHW.  prototype: (K, P, C).  Returns (B, K, H, W)."""
    B, C, H, W = x.shape
    K, P, Cp = prototype.shape
    assert Cp == C
    KP, HW = K * P, H * W

    x = x.astype(jnp.float32)
    proto = prototype.reshape(KP, C).astype(jnp.float32)
    proto_n = proto * jax.lax.rsqrt(
        jnp.maximum(jnp.sum(proto * proto, axis=1, keepdims=True), EPS * EPS))
    x_r = x.reshape(B, C, HW)  # free reshape of NCHW

    if HW % P == 0:
        return _ecc_fused(x_r, proto_n, B, C, H, W, K, P, float(out_scale), hw_tile)
    # scrambled P-groups straddle (b, kp) rows: use the two-kernel path
    return _ecc_two_kernel(x_r, proto_n, B, C, H, W, K, P, float(out_scale),
                           hw_tile, row_tile)


# ------------- pure-JAX reference (mirrors the PyTorch eval forward exactly) -------------
def ecc_forward_ref(x, prototype, out_scale=10.0):
    B, C, H, W = x.shape
    K, P, _ = prototype.shape
    proto = prototype.reshape(-1, C)
    xn = x / jnp.maximum(jnp.sqrt(jnp.sum(x * x, axis=1, keepdims=True)), EPS)
    pn = proto / jnp.maximum(jnp.sqrt(jnp.sum(proto * proto, axis=1, keepdims=True)), EPS)
    d = jnp.einsum("bchw,kc->bkhw", xn, pn)                       # 1x1 conv, NCHW output
    d = d.reshape(B * H * W, K, P)                                # flat NCHW re-view (scramble)
    d = jnp.transpose(d, (1, 0, 2))
    m = jnp.max(d, axis=-1)
    m = jnp.transpose(m.reshape(K, B, H, W), (1, 0, 2, 3))
    return m * out_scale


if __name__ == "__main__":
    # small shapes consistent with the module: channel=32, num_classes=6, P=8
    B, C, H, W = 2, 32, 16, 16
    K, P = 6, 8
    out_scale = 10.0

    key = jax.random.PRNGKey(0)
    k_proto, k_x = jax.random.split(key)
    prototype = jax.random.normal(k_proto, (K, P, C), dtype=jnp.float32)  # torch.randn(K,P,C)
    x = jax.random.normal(k_x, (B, C, H, W), dtype=jnp.float32)

    out = jax.block_until_ready(ecc_forward(x, prototype, out_scale))
    ref = jax.block_until_ready(ecc_forward_ref(x, prototype, out_scale))

    assert out.shape == (B, K, H, W)
    assert jnp.allclose(out, ref, rtol=1e-4, atol=1e-4), float(jnp.max(jnp.abs(out - ref)))

    print("KERNEL_OK")
</pallas_src>

<mosaic_0001>
module attributes {stable_mosaic.version = 11 : i64} {
  func.func @_ecc_fused_kernel(%arg0: i32, %arg1: i32, %arg2: memref<1x32x256xf32, #tpu.memory_space<vmem>>, %arg3: memref<128x32xf32, #tpu.memory_space<vmem>>, %arg4: memref<1x48x32xf32, #tpu.memory_space<vmem>>) attributes {dimension_semantics = [#tpu.dimension_semantics<parallel>, #tpu.dimension_semantics<parallel>], iteration_bounds = array<i64: 2, 1>, scalar_prefetch = 0 : i64, scratch_operands = 0 : i64, tpu.core_type = #tpu.core_type<tc>, window_params = [{transform_indices = @transform_0, window_bounds = array<i64: 1, 32, 256>}, {pipeline_mode = #tpu.pipeline_mode<synchronous>, transform_indices = @transform_1, window_bounds = array<i64: 128, 32>}, {transform_indices = @transform_2, window_bounds = array<i64: 1, 48, 32>}]} {
    %c0 = arith.constant 0 : index
    %c0_0 = arith.constant 0 : index
    %c0_1 = arith.constant 0 : index
    %0 = vector.load %arg2[%c0, %c0_0, %c0_1] : memref<1x32x256xf32, #tpu.memory_space<vmem>>, vector<1x32x256xf32>
    %1 = vector.shape_cast %0 : vector<1x32x256xf32> to vector<32x256xf32>
    %2 = arith.mulf %1, %1 : vector<32x256xf32>
    %cst = arith.constant dense<0.000000e+00> : vector<256xf32>
    %3 = vector.multi_reduction <add>, %2, %cst [0] : vector<32x256xf32> to vector<256xf32>
    %4 = vector.shape_cast %3 : vector<256xf32> to vector<1x256xf32>
    %cst_2 = arith.constant 1.000000e-24 : f32
    %5 = vector.broadcast %cst_2 : f32 to vector<1x256xf32>
    %6 = arith.maximumf %4, %5 : vector<1x256xf32>
    %7 = math.rsqrt %6 : vector<1x256xf32>
    %c0_3 = arith.constant 0 : index
    %c0_4 = arith.constant 0 : index
    %8 = vector.load %arg3[%c0_3, %c0_4] : memref<128x32xf32, #tpu.memory_space<vmem>>, vector<128x32xf32>
    %cst_5 = arith.constant dense<0.000000e+00> : vector<128x256xf32>
    %9 = tpu.matmul %8, %1, %cst_5 {dimension_numbers = #tpu.dot_dimension_numbers<[1], [0], [0], [1], [0, 0, 1, 1], [], []>} : vector<128x32xf32>, vector<32x256xf32>, vector<128x256xf32> -> vector<128x256xf32>
    %10 = vector.broadcast %7 : vector<1x256xf32> to vector<128x256xf32>
    %11 = arith.mulf %9, %10 : vector<128x256xf32>
    %12 = tpu.transpose %11, [1, 0] : vector<128x256xf32> -> vector<256x128xf32>
    %13 = vector.shape_cast %12 : vector<256x128xf32> to vector<32x8x128xf32>
    %cst_6 = arith.constant dense<0xFF800000> : vector<32x128xf32>
    %14 = vector.multi_reduction <maximumf>, %13, %cst_6 [1] : vector<32x8x128xf32> to vector<32x128xf32>
    %15 = tpu.transpose %14, [1, 0] : vector<32x128xf32> -> vector<128x32xf32>
    %16 = vector.extract_strided_slice %15 {offsets = [0, 0], sizes = [48, 32], strides = [1, 1]} : vector<128x32xf32> to vector<48x32xf32>
    %c0_7 = arith.constant 0 : index
    %c0_8 = arith.constant 0 : index
    %c0_9 = arith.constant 0 : index
    %17 = vector.load %arg4[%c0_7, %c0_8, %c0_9] : memref<1x48x32xf32, #tpu.memory_space<vmem>>, vector<1x48x32xf32>
    %18 = vector.shape_cast %17 : vector<1x48x32xf32> to vector<48x32xf32>
    %19 = vector.shape_cast %16 : vector<48x32xf32> to vector<1x48x32xf32>
    tpu.vector_store %arg4[%c0_7, %c0_8, %c0_9], %19 {strides = array<i32>} : memref<1x48x32xf32, #tpu.memory_space<vmem>>, vector<1x48x32xf32>,
    return
  }
  func.func @transform_0(%arg0: i32, %arg1: i32) -> (i32, i32, i32) {
    %c0_i32 = arith.constant 0 : i32
    %c0_i32_0 = arith.constant 0 : i32
    return %arg0, %c0_i32, %arg1 : i32, i32, i32
  }
  func.func @transform_1(%arg0: i32, %arg1: i32) -> (i32, i32) {
    %c0_i32 = arith.constant 0 : i32
    %c0_i32_0 = arith.constant 0 : i32
    %c0_i32_1 = arith.constant 0 : i32
    return %c0_i32, %c0_i32_0 : i32, i32
  }
  func.func @transform_2(%arg0: i32, %arg1: i32) -> (i32, i32, i32) {
    %c0_i32 = arith.constant 0 : i32
    %c0_i32_0 = arith.constant 0 : i32
    return %arg0, %c0_i32, %arg1 : i32, i32, i32
  }
}

</mosaic_0001>

<bundles_post_ra>
// kernel: tpu_custom_call.1
= control target key start
LH: loop header
LB: loop body
LE: loop exit
PB: predicated region body
PF: predicated region fallthrough
CT: control target
= control target key end

     0   :  { %s1029_s9 = smov 0   ;;  %s1031_s10 = smov 0   ;;  %s1252_s0 = inlined_call_operand.vmem [shape: f32[2,32,256], index: 0, kind: input, shape index: {}]   ;;  %s1253_s1 = inlined_call_operand.vmem [shape: f32[128,32], index: 1, kind: input, shape index: {}]   ;;  %s1254_s2 = inlined_call_operand.vmem [shape: f32[2,48,32], index: 2, kind: output, shape index: {}]  }
   0x1   :  { %s1033_s11 = smov 0  }
   0x2 LB: > { %s24_s12 = sadd.s32 1, %s1007_s10  ;;  %p928_p0 = scmp.ge.s32.totalorder %s1011_s11, 1  ;;  %s1011_s11 = sphi %s1033_s11, %s12_s11   ;;  %s1007_s10 = sphi %s1031_s10, %s1256_s10   ;;  %s1003_s9 = sphi %s1029_s9, %s1255_s9  }
   0x3   : > { %p26_p1 = scmp.ge.s32.totalorder %s24_s12, 2  ;;  %p133_p2 = scmp.lt.s32.totalorder %s1011_s11, 3 }
   0x5   : > { %s1258_s12 = smov (%p26_p1, %s24_s12), 0  ;;  %p134_p3 = pnand %p928_p0, %p133_p2 }
   0x6   : > { %p163_p4 = scmp.lt.s32.totalorder (!%p134_p3), %s1003_s9, 1 }
   0x7   : > { %137 = sbr.rel (%p134_p3) target bundleno = 559 (0x22f), region = 28 }
   0xc   : > { %v1013_v0 = vmov 0.0   ;;  %s1260_s9 = smov (!%p163_p4, %s1003_s9), 1  ;;  %v218_v19 = vld [vmem:[%s1253_s1] sm:$0xff]  ;;  %vm234_vm0 = vcmask 261120   ;;  %v219_v25 = vld [vmem:[%s1253_s1 + $0x8] sm:$0xff]  ;;  %v220_v27 = vld [vmem:[%s1253_s1 + $0x10] sm:$0xff] }
   0xd   : > { %347 = vmatprep.mubr.f32.mxu0 %v1013_v0  ;;  %395 = vmatprep.mubr.f32.mxu1 %v1013_v0  ;;  %s950_s13 = sshll.u32 %s1260_s9, 6  ;;  %v226_v20 = vld [vmem:[%s1253_s1 + $0x40] sm:$0xff]  ;;  %v227_v26 = vld [vmem:[%s1253_s1 + $0x48] sm:$0xff]  ;;  %v228_v28 = vld [vmem:[%s1253_s1 + $0x50] sm:$0xff]  ;;  %vm764_vm1 = vcmask 1041409   ;;  %vm766_vm2 = vcmask 1042434  }
   0xe   : > { %s170_s16 = scalar_lea.vmem %s1252_s0, %s950_s13  ;;  %v221_v29 = vld [vmem:[%s1253_s1 + $0x18] sm:$0xff]  ;;  %v222_v31 = vld [vmem:[%s1253_s1 + $0x20] sm:$0xff]  ;;  %v223_v33 = vld [vmem:[%s1253_s1 + $0x28] sm:$0xff]  ;;  %vm768_vm3 = vcmask 1043459   ;;  %vm770_vm4 = vcmask 1044484   ;;  %vm772_vm5 = vcmask 1045509  }
   0xf   : > { %v187_v1 = vld [vmem:[%s170_s16 + $0x38] sm:$0xff]  ;;  %v186_v2 = vld [vmem:[%s170_s16 + $0x30] sm:$0xff]  ;;  %v185_v3 = vld [vmem:[%s170_s16 + $0x28] sm:$0xff]  ;;  %vm774_vm6 = vcmask 1046534   ;;  %vm776_vm7 = vcmask 1047559   ;;  %s959_s25 = smul.u32 48, %s1260_s9 }
  0x10   : > { %307 = vmatprep.subr.mxu0 %v187_v1  ;;  %v184_v4 = vld [vmem:[%s170_s16 + $0x20] sm:$0xff]  ;;  %v183_v5 = vld [vmem:[%s170_s16 + $0x18] sm:$0xff]  ;;  %v182_v6 = vld [vmem:[%s170_s16 + $0x10] sm:$0xff]  ;;  %951 = vmatprep.subr.mxu1 %v187_v1  ;;  %v193_v7 = vmul.f32 %v185_v3, %v185_v3  ;;  %v195_v15 = vmul.f32 %v187_v1, %v187_v1  ;;  %v194_v16 = vmul.f32 %v186_v2, %v186_v2 }
  0x11   : > { %308 = vmatpush1.msra.mxu0 %v186_v2  ;;  %v191_v8 = vmul.f32 %v183_v5, %v183_v5  ;;  %v190_v9 = vmul.f32 %v182_v6, %v182_v6  ;;  %v181_v10 = vld [vmem:[%s170_s16 + $0x8] sm:$0xff]  ;;  %v180_v11 = vld [vmem:[%s170_s16] sm:$0xff]  ;;  %955 = vmatpush1.msra.mxu1 %v186_v2  ;;  %v192_v12 = vmul.f32 %v184_v4, %v184_v4  ;;  %v229_v30 = vld [vmem:[%s1253_s1 + $0x58] sm:$0xff]  ;;  %s179_s28 = scalar_lea.vmem %s1254_s2, %s959_s25 }
  0x12   : > { %309 = vmatprep.subr.mxu0 %v185_v3  ;;  %v189_v13 = vmul.f32 %v181_v10, %v181_v10  ;;  %v188_v14 = vmul.f32 %v180_v11, %v180_v11  ;;  %952 = vmatprep.subr.mxu1 %v185_v3  ;;  %v230_v32 = vld [vmem:[%s1253_s1 + $0x60] sm:$0xff]  ;;  %v231_v34 = vld [vmem:[%s1253_s1 + $0x68] sm:$0xff]  ;;  %v224_v35 = vld [vmem:[%s1253_s1 + $0x30] sm:$0xff] }
  0x13   : > { %310 = vmatpush1.msra.mxu0 %v184_v4  ;;  %956 = vmatpush1.msra.mxu1 %v184_v4  ;;  %v232_v36 = vld [vmem:[%s1253_s1 + $0x70] sm:$0xff]  ;;  %v225_v37 = vld [vmem:[%s1253_s1 + $0x38] sm:$0xff] }
  0x14   : > { %311 = vmatprep.subr.mxu0 %v183_v5  ;;  %v205_v17 = vadd.f32 %v191_v8, %v189_v13  ;;  %v196_v18 = vadd.f32 %v190_v9, %v188_v14  ;;  %953 = vmatprep.subr.mxu1 %v183_v5  ;;  %v233_v38 = vld [vmem:[%s1253_s1 + $0x78] sm:$0xff] }
  0x15   : > { %312 = vmatpush1.msra.mxu0 %v182_v6  ;;  %957 = vmatpush1.msra.mxu1 %v182_v6 }
  0x16   : > { %v206_v21 = vadd.f32 %v205_v17, %v193_v7  ;;  %313 = vmatprep.subr.mxu0 %v181_v10  ;;  %v197_v22 = vadd.f32 %v196_v18, %v192_v12  ;;  %954 = vmatprep.subr.mxu1 %v181_v10 }
  0x17   : > { %314 = vmatpush1.msra.mxu0 %v180_v11  ;;  %958 = vmatpush1.msra.mxu1 %v180_v11 }
  0x18   : > { %v207_v23 = vadd.f32 %v206_v21, %v195_v15  ;;  %v198_v24 = vadd.f32 %v197_v22, %v194_v16  ;;  %932 = vmatmul.mubr.msk.f32.vlgmr.msra.gmra.mxu0 %vm234_vm0, %v218_v19  ;;  %940 = vmatmul.mubr.msk.f32.vlgmr.msra.gmra.mxu1 %vm234_vm0, %v226_v20 }
  0x19   : > { %353 = vmatprep.mubr.f32.mxu0 %v1013_v0  ;;  %401 = vmatprep.mubr.f32.mxu1 %v1013_v0 }
  0x1a   : > { %v199_v39 = vrot.slane %v198_v24, 4  ;;  %v208_v40 = vrot.slane %v207_v23, 4 }
  0x1c   : > { %933 = vmatmul.mubr.msk.f32.gmra.mxu0 %vm234_vm0, %v219_v25  ;;  %941 = vmatmul.mubr.msk.f32.gmra.mxu1 %vm234_vm0, %v227_v26  ;;  %v200_v41 = vadd.f32 %v199_v39, %v198_v24  ;;  %v209_v42 = vadd.f32 %v208_v40, %v207_v23 }
  0x1d   : > { %359 = vmatprep.mubr.f32.mxu0 %v1013_v0  ;;  %407 = vmatprep.mubr.f32.mxu1 %v1013_v0 }
  0x1e   : > { %v201_v43 = vrot.slane %v200_v41, 2  ;;  %v210_v44 = vrot.slane %v209_v42, 2 }
  0x20   : > { %934 = vmatmul.mubr.msk.f32.gmra.mxu0 %vm234_vm0, %v220_v27  ;;  %942 = vmatmul.mubr.msk.f32.gmra.mxu1 %vm234_vm0, %v228_v28  ;;  %v202_v45 = vadd.f32 %v201_v43, %v200_v41  ;;  %v211_v46 = vadd.f32 %v210_v44, %v209_v42 }
  0x21   : > { %365 = vmatprep.mubr.f32.mxu0 %v1013_v0  ;;  %413 = vmatprep.mubr.f32.mxu1 %v1013_v0 }
  0x22   : > { %v203_v47 = vrot.slane %v202_v45, 1  ;;  %v212_v48 = vrot.slane %v211_v46, 1 }
  0x24   : > { %935 = vmatmul.mubr.msk.f32.gmra.mxu0 %vm234_vm0, %v221_v29  ;;  %943 = vmatmul.mubr.msk.f32.gmra.mxu1 %vm234_vm0, %v229_v30  ;;  %v204_v49 = vadd.f32 %v203_v47, %v202_v45  ;;  %v213_v50 = vadd.f32 %v212_v48, %v211_v46 }
  0x25   : > { %371 = vmatprep.mubr.f32.mxu0 %v1013_v0  ;;  %419 = vmatprep.mubr.f32.mxu1 %v1013_v0 }
  0x26   : > { %v214_v51 = vmax.f32 %v204_v49, 1e-24  ;;  %v215_v52 = vmax.f32 %v213_v50, 1e-24 }
  0x28   : > { %936 = vmatmul.mubr.msk.f32.gmra.mxu0 %vm234_vm0, %v222_v31  ;;  %944 = vmatmul.mubr.msk.f32.gmra.mxu1 %vm234_vm0, %v230_v32  ;;  %985 = vrsqrt.f32 %v214_v51 }
  0x29   : > { %377 = vmatprep.mubr.f32.mxu0 %v1013_v0  ;;  %425 = vmatprep.mubr.f32.mxu1 %v1013_v0  ;;  %987 = vrsqrt.f32 %v215_v52 }
  0x2c   : > { %937 = vmatmul.mubr.msk.f32.gmra.mxu0 %vm234_vm0, %v223_v33  ;;  %945 = vmatmul.mubr.msk.f32.gmra.mxu1 %vm234_vm0, %v231_v34 }
  0x2d   : > { %383 = vmatprep.mubr.f32.mxu0 %v1013_v0  ;;  %431 = vmatprep.mubr.f32.mxu1 %v1013_v0 }
  0x30   : > { %938 = vmatmul.mubr.msk.f32.gmra.mxu0 %vm234_vm0, %v224_v35  ;;  %946 = vmatmul.mubr.msk.f32.gmra.mxu1 %vm234_vm0, %v232_v36 }
  0x31   : > { %389 = vmatprep.mubr.f32.mxu0 %v1013_v0  ;;  %437 = vmatprep.mubr.f32.mxu1 %v1013_v0 }
  0x34   : > { %939 = vmatmul.mubr.msk.f32.gmra.mxu0 %vm234_vm0, %v225_v37  ;;  %947 = vmatmul.mubr.msk.f32.gmra.mxu1 %vm234_vm0, %v233_v38 }
  0x35   : > { %v1133_v53 = vpop.eup %985 }
  0x36   : > { %v1135_v54 = vpop.eup %987 }
  0xd8   : > { %v349_v55 = vpop.f32.mrf.mxu0  ;;  %v397_v56 = vpop.f32.mrf.mxu1 }
  0xd9   : > { %v444_v57 = vmul.f32 %v1133_v53, %v349_v55  ;;  %v460_v31 = vmul.f32 %v1133_v53, %v397_v56 }
  0xda   : > { %v351_v58 = vpop.f32.mrf.mxu0  ;;  %v399_v61 = vpop.f32.mrf.mxu1 }
  0xdb   : > { %476 = vxpose.xlu0.b32.start [1/16] %v444_v57, 128  ;;  %v445_v59 = vmul.f32 %v1135_v54, %v351_v58  ;;  %v461_v33 = vmul.f32 %v1135_v54, %v399_v61 }
  0xdc   : > { %v355_v60 = vpop.f32.mrf.mxu0  ;;  %v403_v2 = vpop.f32.mrf.mxu1 }
  0xdd   : > { %v446_v62 = vmul.f32 %v1133_v53, %v355_v60  ;;  %508 = vxpose.xlu1.b32.start [1/16] %v445_v59, 128  ;;  %v462_v34 = vmul.f32 %v1133_v53, %v403_v2 }
  0xde   : > { %v357_v63 = vpop.f32.mrf.mxu0  ;;  %v405_v7 = vpop.f32.mrf.mxu1 }
  0xdf   : > { %v447_v0 = vmul.f32 %v1135_v54, %v357_v63  ;;  %477 = vxpose.xlu0.b32.cont [2/16] %v446_v62, 128  ;;  %v463_v36 = vmul.f32 %v1135_v54, %v405_v7 }
  0xe0   : > { %v361_v1 = vpop.f32.mrf.mxu0  ;;  %v409_v12 = vpop.f32.mrf.mxu1 }
  0xe1   : > { %v448_v3 = vmul.f32 %v1133_v53, %v361_v1  ;;  %509 = vxpose.xlu1.b32.cont [2/16] %v447_v0, 128  ;;  %v464_v37 = vmul.f32 %v1133_v53, %v409_v12 }
  0xe2   : > { %v363_v4 = vpop.f32.mrf.mxu0  ;;  %v411_v17 = vpop.f32.mrf.mxu1 }
  0xe3   : > { %v449_v5 = vmul.f32 %v1135_v54, %v363_v4  ;;  %478 = vxpose.xlu0.b32.cont [3/16] %v448_v3, 128  ;;  %v465_v39 = vmul.f32 %v1135_v54, %v411_v17 }
  0xe4   : > { %v367_v6 = vpop.f32.mrf.mxu0  ;;  %v415_v22 = vpop.f32.mrf.mxu1 }
  0xe5   : > { %v450_v8 = vmul.f32 %v1133_v53, %v367_v6  ;;  %510 = vxpose.xlu1.b32.cont [3/16] %v449_v5, 128  ;;  %v466_v40 = vmul.f32 %v1133_v53, %v415_v22 }
  0xe6   : > { %v369_v9 = vpop.f32.mrf.mxu0  ;;  %v417_v27 = vpop.f32.mrf.mxu1 }
  0xe7   : > { %v451_v10 = vmul.f32 %v1135_v54, %v369_v9  ;;  %479 = vxpose.xlu0.b32.cont [4/16] %v450_v8, 128  ;;  %v467_v42 = vmul.f32 %v1135_v54, %v417_v27 }
  0xe8   : > { %v373_v11 = vpop.f32.mrf.mxu0  ;;  %v421_v32 = vpop.f32.mrf.mxu1 }
  0xe9   : > { %v452_v13 = vmul.f32 %v1133_v53, %v373_v11  ;;  %511 = vxpose.xlu1.b32.cont [4/16] %v451_v10, 128  ;;  %v468_v43 = vmul.f32 %v1133_v53, %v421_v32 }
  0xea   : > { %v375_v14 = vpop.f32.mrf.mxu0  ;;  %v423_v35 = vpop.f32.mrf.mxu1 }
  0xeb   : > { %v453_v15 = vmul.f32 %v1135_v54, %v375_v14  ;;  %480 = vxpose.xlu0.b32.cont [5/16] %v452_v13, 128  ;;  %v469_v45 = vmul.f32 %v1135_v54, %v423_v35 }
  0xec   : > { %v379_v16 = vpop.f32.mrf.mxu0  ;;  %v427_v38 = vpop.f32.mrf.mxu1 }
  0xed   : > { %v454_v18 = vmul.f32 %v1133_v53, %v379_v16  ;;  %512 = vxpose.xlu1.b32.cont [5/16] %v453_v15, 128  ;;  %v470_v46 = vmul.f32 %v1133_v53, %v427_v38 }
  0xee   : > { %v381_v19 = vpop.f32.mrf.mxu0  ;;  %v429_v41 = vpop.f32.mrf.mxu1 }
  0xef   : > { %v455_v20 = vmul.f32 %v1135_v54, %v381_v19  ;;  %481 = vxpose.xlu0.b32.cont [6/16] %v454_v18, 128  ;;  %v471_v48 = vmul.f32 %v1135_v54, %v429_v41 }
  0xf0   : > { %v385_v21 = vpop.f32.mrf.mxu0  ;;  %v433_v44 = vpop.f32.mrf.mxu1 }
  0xf1   : > { %v456_v23 = vmul.f32 %v1133_v53, %v385_v21  ;;  %513 = vxpose.xlu1.b32.cont [6/16] %v455_v20, 128  ;;  %v472_v49 = vmul.f32 %v1133_v53, %v433_v44 }
  0xf2   : > { %v387_v24 = vpop.f32.mrf.mxu0  ;;  %v435_v47 = vpop.f32.mrf.mxu1 }
  0xf3   : > { %v457_v25 = vmul.f32 %v1135_v54, %v387_v24  ;;  %482 = vxpose.xlu0.b32.cont [7/16] %v456_v23, 128  ;;  %v473_v51 = vmul.f32 %v1135_v54, %v435_v47 }
  0xf4   : > { %v391_v26 = vpop.f32.mrf.mxu0  ;;  %v439_v50 = vpop.f32.mrf.mxu1 }
  0xf5   : > { %v458_v28 = vmul.f32 %v1133_v53, %v391_v26  ;;  %514 = vxpose.xlu1.b32.cont [7/16] %v457_v25, 128  ;;  %v474_v52 = vmul.f32 %v1133_v53, %v439_v50 }
  0xf6   : > { %v393_v29 = vpop.f32.mrf.mxu0  ;;  %v441_v55 = vpop.f32.mrf.mxu1 }
  0xf7   : > { %v459_v30 = vmul.f32 %v1135_v54, %v393_v29  ;;  %483 = vxpose.xlu0.b32.cont [8/16] %v458_v28, 128  ;;  %v475_v56 = vmul.f32 %v1135_v54, %v441_v55 }
  0xf9   : > { %515 = vxpose.xlu1.b32.cont [8/16] %v459_v30, 128 }
  0xfb   : > { %484 = vxpose.xlu0.b32.cont [9/16] %v460_v31, 128 }
  0xfd   : > { %516 = vxpose.xlu1.b32.cont [9/16] %v461_v33, 128 }
  0xff   : > { %485 = vxpose.xlu0.b32.cont [10/16] %v462_v34, 128 }
 0x101   : > { %517 = vxpose.xlu1.b32.cont [10/16] %v463_v36, 128 }
 0x103   : > { %486 = vxpose.xlu0.b32.cont [11/16] %v464_v37, 128 }
 0x105   : > { %518 = vxpose.xlu1.b32.cont [11/16] %v465_v39, 128 }
 0x107   : > { %487 = vxpose.xlu0.b32.cont [12/16] %v466_v40, 128 }
 0x109   : > { %519 = vxpose.xlu1.b32.cont [12/16] %v467_v42, 128 }
 0x10b   : > { %488 = vxpose.xlu0.b32.cont [13/16] %v468_v43, 128 }
 0x10d   : > { %520 = vxpose.xlu1.b32.cont [13/16] %v469_v45, 128 }
 0x10f   : > { %489 = vxpose.xlu0.b32.cont [14/16] %v470_v46, 128 }
 0x111   : > { %521 = vxpose.xlu1.b32.cont [14/16] %v471_v48, 128 }
 0x113   : > { %490 = vxpose.xlu0.b32.cont [15/16] %v472_v49, 128 }
 0x115   : > { %522 = vxpose.xlu1.b32.cont [15/16] %v473_v51, 128 }
 0x117   : > { %491 = vxpose.xlu0.b32.end [16/16] %v474_v52, 128 }
 0x119   : > { %523 = vxpose.xlu1.b32.end [16/16] %v475_v56, 128 }
 0x157   : > { %v492_v57 = vpop.trf.xlu0 }
 0x158   : > { %v540_v2 = vrot.slane %v492_v57, 4 }
 0x159   : > { %v524_v58 = vpop.trf.xlu1 }
 0x15a   : > { %v541_v7 = vmax.f32 %v492_v57, %v540_v2  ;;  %v636_v24 = vrot.slane %v524_v58, 4 }
 0x15b   : > { %v493_v59 = vpop.trf.xlu0 }
 0x15c   : > { %v546_v63 = vrot.slane %v493_v59, 4  ;;  %v542_v15 = vrot.slane %v541_v7, 2  ;;  %v637_v39 = vmax.f32 %v524_v58, %v636_v24 }
 0x15d   : > { %v525_v60 = vpop.trf.xlu1 }
 0x15e   : > { %v547_v53 = vmax.f32 %v493_v59, %v546_v63  ;;  %v642_v16 = vrot.slane %v525_v60, 4  ;;  %v543_v28 = vmax.f32 %v541_v7, %v542_v15 }
 0x15f   : > { %v494_v61 = vpop.trf.xlu0 }
 0x160   : > { %v552_v1 = vrot.slane %v494_v61, 4  ;;  %v548_v10 = vrot.slane %v547_v53, 2  ;;  %v643_v29 = vmax.f32 %v525_v60, %v642_v16  ;;  %v544_v43 = vrot.slane %v543_v28, 1 }
 0x161   : > { %v526_v62 = vpop.trf.xlu1 }
 0x162   : > { %v553_v6 = vmax.f32 %v494_v61, %v552_v1  ;;  %v549_v21 = vmax.f32 %v547_v53, %v548_v10  ;;  %v648_v22 = vrot.slane %v526_v62, 4  ;;  %v644_v44 = vrot.slane %v643_v29, 2 }
 0x163   : > { %v495_v0 = vpop.trf.xlu0  ;;  %v545_v61 = vmax.f32 %v543_v28, %v544_v43 }
 0x164   : > { %v558_v3 = vrot.slane %v495_v0, 4  ;;  %v554_v13 = vrot.slane %v553_v6, 2  ;;  %v550_v35 = vrot.slane %v549_v21, 1  ;;  %v649_v36 = vmax.f32 %v526_v62, %v648_v22 }
 0x165   : > { %v527_v4 = vpop.trf.xlu1  ;;  %v638_v62 = vrot.slane %v637_v39, 2  ;;  %v645_v63 = vmax.f32 %v643_v29, %v644_v44 }
 0x166   : > { %v559_v8 = vmax.f32 %v495_v0, %v558_v3  ;;  %v555_v25 = vmax.f32 %v553_v6, %v554_v13  ;;  %v654_v31 = vrot.slane %v527_v4, 4  ;;  %v551_v52 = vmax.f32 %v549_v21, %v550_v35 }
 0x167   : > { %v496_v5 = vpop.trf.xlu0  ;;  %v650_v55 = vrot.slane %v649_v36, 2  ;;  %v639_v13 = vmax.f32 %v637_v39, %v638_v62 }
 0x168   : > { %v564_v54 = vrot.slane %v496_v5, 4  ;;  %v560_v17 = vrot.slane %v559_v8, 2  ;;  %v556_v40 = vrot.slane %v555_v25, 1  ;;  %v655_v46 = vmax.f32 %v527_v4, %v654_v31 }
 0x169   : > { %v528_v9 = vpop.trf.xlu1  ;;  %v651_v6 = vmax.f32 %v649_v36, %v650_v55  ;;  %v640_v29 = vrot.slane %v639_v13, 1 }
 0x16a   : > { %v565_v11 = vmax.f32 %v496_v5, %v564_v54  ;;  %v561_v30 = vmax.f32 %v559_v8, %v560_v17  ;;  %v660_v49 = vrot.slane %v528_v9, 4  ;;  %v557_v59 = vmax.f32 %v555_v25, %v556_v40 }
 0x16b   : > { %v497_v12 = vpop.trf.xlu0  ;;  %v656_v2 = vrot.slane %v655_v46, 2  ;;  %v765_v5 = vsel %vm764_vm1, %v551_v52, %v545_v61 }
 0x16c   : > { %v570_v14 = vrot.slane %v497_v12, 4  ;;  %v566_v19 = vrot.slane %v565_v11, 2  ;;  %v562_v45 = vrot.slane %v561_v30, 1  ;;  %v661_v4 = vmax.f32 %v528_v9, %v660_v49 }
 0x16d   : > { %v1169_v18 = vpop.trf.xlu1  ;;  %v767_v54 = vsel %vm766_vm2, %v557_v59, %v765_v5  ;;  %v657_v9 = vmax.f32 %v655_v46, %v656_v2 }
 0x16e   : > { %v571_v20 = vmax.f32 %v497_v12, %v570_v14  ;;  %v567_v33 = vmax.f32 %v565_v11, %v566_v19  ;;  %v563_v0 = vmax.f32 %v561_v30, %v562_v45  ;;  %v666_v10 = vrot.slane %v1169_v18, 4 }
 0x16f   : > { %v498_v23 = vpop.trf.xlu0  ;;  %v646_v14 = vrot.slane %v645_v63, 1  ;;  %v662_v17 = vrot.slane %v661_v4, 2 }
 0x170   : > { %v572_v26 = vrot.slane %v571_v20, 2  ;;  %v576_v27 = vrot.slane %v498_v23, 4  ;;  %v568_v48 = vrot.slane %v567_v33, 1  ;;  %v769_v16 = vsel %vm768_vm3, %v563_v0, %v767_v54 }
 0x171   : > { %v1171_v32 = vpop.trf.xlu1  ;;  %v663_v35 = vmax.f32 %v661_v4, %v662_v17 }
 0x172   : > { %v577_v34 = vmax.f32 %v498_v23, %v576_v27  ;;  %v573_v37 = vmax.f32 %v571_v20, %v572_v26  ;;  %v569_v3 = vmax.f32 %v567_v33, %v568_v48  ;;  %v672_v19 = vrot.slane %v1171_v32, 4 }
 0x173   : > { %v499_v38 = vpop.trf.xlu0  ;;  %v652_v26 = vrot.slane %v651_v6, 1  ;;  %v667_v27 = vmax.f32 %v1169_v18, %v666_v10  ;;  %v641_v18 = vmax.f32 %v639_v13, %v640_v29 }
 0x174   : > { %v578_v41 = vrot.slane %v577_v34, 2  ;;  %v582_v42 = vrot.slane %v499_v38, 4  ;;  %v574_v56 = vrot.slane %v573_v37, 1  ;;  %v771_v20 = vsel %vm770_vm4, %v569_v3, %v769_v16 }
 0x175   : > { %v531_v47 = vpop.trf.xlu1  ;;  %v673_v36 = vmax.f32 %v1171_v32, %v672_v19 }
 0x176   : > { %v579_v50 = vmax.f32 %v577_v34, %v578_v41  ;;  %v583_v51 = vmax.f32 %v499_v38, %v582_v42  ;;  %v575_v7 = vmax.f32 %v573_v37, %v574_v56  ;;  %v678_v21 = vrot.slane %v531_v47, 4 }
 0x177   : > { %v500_v57 = vpop.trf.xlu0  ;;  %v658_v34 = vrot.slane %v657_v9, 1  ;;  %v647_v37 = vmax.f32 %v645_v63, %v646_v14  ;;  %v653_v41 = vmax.f32 %v651_v6, %v652_v26  ;;  %v668_v42 = vrot.slane %v667_v27, 2 }
 0x178   : > { %v580_v60 = vrot.slane %v579_v50, 1  ;;  %v584_v58 = vrot.slane %v583_v51, 2  ;;  %v588_v22 = vrot.slane %v500_v57, 4  ;;  %v773_v25 = vsel %vm772_vm5, %v575_v7, %v771_v20 }
 0x179   : > { %v532_v1 = vpop.trf.xlu1  ;;  %v679_v38 = vmax.f32 %v531_v47, %v678_v21  ;;  %v659_v49 = vmax.f32 %v657_v9, %v658_v34  ;;  %v785_v52 = vsel %vm764_vm1, %v647_v37, %v641_v18 }
 0x17a   : > { %v585_v53 = vmax.f32 %v583_v51, %v584_v58  ;;  %v581_v11 = vmax.f32 %v579_v50, %v580_v60  ;;  %v589_v39 = vmax.f32 %v500_v57, %v588_v22  ;;  %v684_v44 = vrot.slane %v532_v1, 4 }
 0x17b   : > { %v501_v8 = vpop.trf.xlu0  ;;  %v664_v50 = vrot.slane %v663_v35, 1  ;;  %v674_v51 = vrot.slane %v673_v36, 2  ;;  %v680_v55 = vrot.slane %v679_v38, 2  ;;  %v786_v47 = vsel %vm766_vm2, %v653_v41, %v785_v52 }
 0x17c   : > { %v586_v12 = vrot.slane %v585_v53, 1  ;;  %v775_v28 = vsel %vm774_vm6, %v581_v11, %v773_v25  ;;  %v594_v30 = vrot.slane %v501_v8, 4  ;;  %v590_v32 = vrot.slane %v589_v39, 2 }
 0x17d   : > { %v533_v15 = vpop.trf.xlu1  ;;  %v1186_v57 = vmax.f32 %v667_v27, %v668_v42  ;;  %v685_v58 = vmax.f32 %v532_v1, %v684_v44  ;;  %v1189_v2 = vsel %vm768_vm3, %v659_v49, %v786_v47  ;;  %v1191_v3 = vmax.f32 %v663_v35, %v664_v50 }
 0x17e   : > { %v587_v24 = vmax.f32 %v585_v53, %v586_v12  ;;  %v595_v45 = vmax.f32 %v501_v8, %v594_v30  ;;  %v690_v59 = vrot.slane %v533_v15, 4  ;;  %v1193_v4 = vmax.f32 %v673_v36, %v674_v51 }
 0x17f   : > { %v502_v23 = vpop.trf.xlu0  ;;  %v1195_v53 = vmax.f32 %v679_v38, %v680_v55  ;;  %v591_v5 = vmax.f32 %v589_v39, %v590_v32  ;;  %v670_v54 = vrot.slane %v1186_v57, 1  ;;  %v686_v12 = vrot.slane %v685_v58, 2 }
 0x180   : > { %v777_v33 = vsel %vm776_vm7, %v587_v24, %v775_v28  ;;  %v600_v43 = vrot.slane %v502_v23, 4  ;;  %v596_v61 = vrot.slane %v595_v45, 2  ;;  %v691_v1 = vmax.f32 %v533_v15, %v690_v59 }
 0x181   : > { %v534_v31 = vpop.trf.xlu1  ;;  %803 = vxpose.xlu0.b32.start [1/4] (short) (narrow) %v777_v33, 48  ;;  %v676_v17 = vrot.slane %v1193_v4, 1  ;;  %v682_v22 = vrot.slane %v1195_v53, 1  ;;  %v1200_v30 = vmax.f32 %v685_v58, %v686_v12 }
 0x182   : > { %v601_v60 = vmax.f32 %v502_v23, %v600_v43  ;;  %v696_v6 = vrot.slane %v534_v31, 4  ;;  %v597_v13 = vmax.f32 %v595_v45, %v596_v61  ;;  %v592_v23 = vrot.slane %v591_v5, 1 }
 0x183   : > { %v503_v40 = vpop.trf.xlu0  ;;  %v692_v27 = vrot.slane %v691_v1, 2 }
 0x184   : > { %v606_v46 = vrot.slane %v503_v40, 4  ;;  %v602_v10 = vrot.slane %v601_v60, 2  ;;  %v697_v24 = vmax.f32 %v534_v31, %v696_v6  ;;  %v598_v33 = vrot.slane %v597_v13, 1 }
 0x185   : > { %v535_v48 = vpop.trf.xlu1  ;;  %v593_v41 = vmax.f32 %v591_v5, %v592_v23  ;;  %v693_v44 = vmax.f32 %v691_v1, %v692_v27 }
 0x186   : > { %v607_v62 = vmax.f32 %v503_v40, %v606_v46  ;;  %v702_v16 = vrot.slane %v535_v48, 4  ;;  %v603_v15 = vmax.f32 %v601_v60, %v602_v10  ;;  %v698_v42 = vrot.slane %v697_v24, 2 }
 0x187   : > { %v504_v56 = vpop.trf.xlu0  ;;  %v599_v50 = vmax.f32 %v597_v13, %v598_v33  ;;  %v677_v33 = vmax.f32 %v1193_v4, %v676_v17 }
 0x188   : > { %v612_v63 = vrot.slane %v504_v56, 4  ;;  %v608_v14 = vrot.slane %v607_v62, 2  ;;  %v703_v35 = vmax.f32 %v535_v48, %v702_v16  ;;  %v604_v45 = vrot.slane %v603_v15, 1 }
 0x189   : > { %v536_v0 = vpop.trf.xlu1  ;;  %v699_v60 = vmax.f32 %v697_v24, %v698_v42  ;;  %v778_v16 = vsel %vm764_vm1, %v599_v50, %v593_v41 }
 0x18a   : > { %v613_v7 = vmax.f32 %v504_v56, %v612_v63  ;;  %v708_v20 = vrot.slane %v536_v0, 4  ;;  %v609_v34 = vmax.f32 %v607_v62, %v608_v14  ;;  %v704_v52 = vrot.slane %v703_v35, 2 }
 0x18b   : > { %v505_v8 = vpop.trf.xlu0  ;;  %v605_v63 = vmax.f32 %v603_v15, %v604_v45  ;;  %v700_v23 = vrot.slane %v699_v60, 1 }
 0x18c   : > { %v618_v11 = vrot.slane %v505_v8, 4  ;;  %v614_v19 = vrot.slane %v613_v7, 2  ;;  %v709_v38 = vmax.f32 %v536_v0, %v708_v20  ;;  %v610_v51 = vrot.slane %v609_v34, 1 }
 0x18d   : > { %v537_v9 = vpop.trf.xlu1  ;;  %v705_v1 = vmax.f32 %v703_v35, %v704_v52  ;;  %v701_v41 = vmax.f32 %v699_v60, %v700_v23 }
 0x18e   : > { %v619_v21 = vmax.f32 %v505_v8, %v618_v11  ;;  %v714_v25 = vrot.slane %v537_v9, 4  ;;  %v615_v37 = vmax.f32 %v613_v7, %v614_v19  ;;  %v710_v56 = vrot.slane %v709_v38, 2 }
 0x18f   : > { %v506_v26 = vpop.trf.xlu0  ;;  %v688_v7 = vrot.slane %v1200_v30, 1  ;;  %v611_v8 = vmax.f32 %v609_v34, %v610_v51  ;;  %v694_v11 = vrot.slane %v693_v44, 1  ;;  %v706_v27 = vrot.slane %v705_v1, 1 }
 0x190   : > { %v620_v28 = vrot.slane %v619_v21, 2  ;;  %v624_v29 = vrot.slane %v506_v26, 4  ;;  %v715_v31 = vmax.f32 %v537_v9, %v714_v25  ;;  %v616_v48 = vrot.slane %v615_v37, 1 }
 0x191   : > { %v538_v36 = vpop.trf.xlu1  ;;  %v711_v13 = vmax.f32 %v709_v38, %v710_v56 }
 0x192   : > { %v625_v39 = vmax.f32 %v506_v26, %v624_v29  ;;  %v720_v40 = vrot.slane %v538_v36, 4  ;;  %v621_v43 = vmax.f32 %v619_v21, %v620_v28  ;;  %v716_v61 = vrot.slane %v715_v31, 2 }
 0x193   : > { %v507_v18 = vpop.trf.xlu0  ;;  %v617_v12 = vmax.f32 %v615_v37, %v616_v48  ;;  %v779_v21 = vsel %vm766_vm2, %v605_v63, %v778_v16  ;;  %v671_v29 = vmax.f32 %v1186_v57, %v670_v54  ;;  %v712_v34 = vrot.slane %v711_v13, 1 }
 0x194   : > { %v626_v46 = vrot.slane %v625_v39, 2  ;;  %v721_v49 = vmax.f32 %v538_v36, %v720_v40  ;;  %v630_v55 = vrot.slane %v507_v18, 4  ;;  %v622_v58 = vrot.slane %v621_v43, 1 }
 0x195   : > { %v539_v32 = vpop.trf.xlu1  ;;  %v717_v19 = vmax.f32 %v715_v31, %v716_v61  ;;  %v780_v26 = vsel %vm768_vm3, %v611_v8, %v779_v21  ;;  %v695_v36 = vmax.f32 %v693_v44, %v694_v11  ;;  %v683_v40 = vmax.f32 %v1195_v53, %v682_v22 }
 0x196   : > { %v627_v47 = vmax.f32 %v625_v39, %v626_v46  ;;  %v726_v59 = vrot.slane %v539_v32, 4  ;;  %v631_v62 = vmax.f32 %v507_v18, %v630_v55  ;;  %v722_v5 = vrot.slane %v721_v49, 2 }
 0x197   : > { %v623_v9 = vmax.f32 %v621_v43, %v622_v58  ;;  %v781_v35 = vsel %vm770_vm4, %v617_v12, %v780_v26  ;;  %v718_v37 = vrot.slane %v717_v19, 1  ;;  %v689_v54 = vmax.f32 %v1200_v30, %v688_v7 }
 0x198   : > { %v628_v0 = vrot.slane %v627_v47, 1  ;;  %v727_v6 = vmax.f32 %v539_v32, %v726_v59  ;;  %v632_v10 = vrot.slane %v631_v62, 2  ;;  %v723_v25 = vmax.f32 %v721_v49, %v722_v5 }
 0x199   : > { %v782_v39 = vsel %vm772_vm5, %v623_v9, %v781_v35  ;;  %v707_v43 = vmax.f32 %v705_v1, %v706_v27  ;;  %v713_v31 = vmax.f32 %v711_v13, %v712_v34  ;;  %v788_v18 = vsel %vm770_vm4, %v1191_v3, %v1189_v2 }
 0x19a   : > { %v728_v14 = vrot.slane %v727_v6, 2  ;;  %v633_v20 = vmax.f32 %v631_v62, %v632_v10  ;;  %v629_v24 = vmax.f32 %v627_v47, %v628_v0  ;;  %v724_v42 = vrot.slane %v723_v25, 1 }
 0x19b   : > { %v792_v44 = vsel %vm764_vm1, %v695_v36, %v689_v54  ;;  %v719_v53 = vmax.f32 %v717_v19, %v718_v37  ;;  %v789_v22 = vsel %vm772_vm5, %v671_v29, %v788_v18 }
 0x19c   : > { %v634_v15 = vrot.slane %v633_v20, 1  ;;  %v729_v28 = vmax.f32 %v727_v6, %v728_v14  ;;  %v783_v57 = vsel %vm774_vm6, %v629_v24, %v782_v39  ;;  %v793_v45 = vsel %vm766_vm2, %v701_v41, %v792_v44 }
 0x19d   : > { %v725_v46 = vmax.f32 %v723_v25, %v724_v42  ;;  %v790_v30 = vsel %vm774_vm6, %v677_v33, %v789_v22  ;;  %v794_v49 = vsel %vm768_vm3, %v707_v43, %v793_v45 }
 0x19e   : > { %v635_v38 = vmax.f32 %v633_v20, %v634_v15  ;;  %v730_v4 = vrot.slane %v729_v28, 1  ;;  %v791_v51 = vsel %vm776_vm7, %v683_v40, %v790_v30  ;;  %v795_v52 = vsel %vm770_vm4, %v713_v31, %v794_v49 }
 0x19f   : > { %v796_v2 = vsel %vm772_vm5, %v719_v53, %v795_v52 }
 0x1a0   : > { %v784_v17 = vsel %vm776_vm7, %v635_v38, %v783_v57  ;;  %v731_v50 = vmax.f32 %v729_v28, %v730_v4  ;;  %v797_v3 = vsel %vm774_vm6, %v725_v46, %v796_v2 }
 0x1a1   : > { %804 = vxpose.xlu0.b32.cont [2/4] (short) (narrow) %v784_v17, 48 }
 0x1a2   : > { %v798_v55 = vsel %vm776_vm7, %v731_v50, %v797_v3 }
 0x1a5   : > { %805 = vxpose.xlu0.b32.cont [3/4] (short) (narrow) %v791_v51, 48 }
 0x1a9   : > { %806 = vxpose.xlu0.b32.end [4/4] (short) (narrow) %v798_v55, 48 }
 0x219   : > { %v819_v32 = vpop.trf.xlu0 }
 0x21a   : > { %835 = vst.msk [vmem:[%s179_s28] sm:$0xff] %vm234_vm0, %v819_v32 }
 0x21d   : > { %v820_v48 = vpop.trf.xlu0 }
 0x21e   : > { %836 = vst.msk [vmem:[%s179_s28 + $0x8] sm:$0xff] %vm234_vm0, %v820_v48 }
 0x221   : > { %v821_v56 = vpop.trf.xlu0 }
 0x222   : > { %837 = vst.msk [vmem:[%s179_s28 + $0x10] sm:$0xff] %vm234_vm0, %v821_v56 }
 0x225   : > { %v822_v47 = vpop.trf.xlu0 }
 0x226   : > { %838 = vst.msk [vmem:[%s179_s28 + $0x18] sm:$0xff] %vm234_vm0, %v822_v47 }
 0x229   : > { %v823_v59 = vpop.trf.xlu0 }
 0x22a   : > { %839 = vst.msk [vmem:[%s179_s28 + $0x20] sm:$0xff] %vm234_vm0, %v823_v59 }
 0x22d   : > { %v824_v60 = vpop.trf.xlu0 }
 0x22e   : > { %840 = vst.msk [vmem:[%s179_s28 + $0x28] sm:$0xff] %vm234_vm0, %v824_v60 }
 0x22f PF: > { %s12_s11 = sadd.s32 1, %s1011_s11   ;;  %s1255_s9 = smov %s1007_s10 }
 0x230   : > { %p9_p5 = scmp.ge.s32.totalorder %s12_s11, 4   ;;  %s1256_s10 = smov %s1258_s12 }
 0x232   :  { %11 = sbr.rel (!%p9_p5) target bundleno = 2 (0x2), region = 58 }

</bundles_post_ra>
